<compile_context>
chip_gen: v7x
topology: tpu7x:2x2x1
jax: 0.10.0
libtpu: 0.0.40
codegen_flags: <defaults>
</compile_context>

<pallas_src>
import functools

import jax
import jax.numpy as jnp
from jax.experimental import pallas as pl
from jax.experimental.pallas import tpu as pltpu

LANES = 128
SUBLANES = 8


def _charbonnier_sum_kernel(x_ref, y_ref, out_ref, acc_ref, *, eps2):
    """Accumulate sum(sqrt((x - y)^2 + eps^2)) over the inner grid axis."""
    i = pl.program_id(1)

    @pl.when(i == 0)
    def _():
        acc_ref[...] = jnp.zeros_like(acc_ref)

    x = x_ref[...].astype(jnp.float32)
    y = y_ref[...].astype(jnp.float32)
    d = x - y
    val = jnp.sqrt(d * d + jnp.float32(eps2))

    # Fold the (block_rows, 128) tile into one (8, 128) vreg with elementwise
    # VPU adds; defer the cross-lane/sublane reduce to the epilogue.
    acc_ref[...] += val.reshape(-1, SUBLANES, LANES).sum(axis=0)

    @pl.when(i == pl.num_programs(1) - 1)
    def _():
        out_ref[0, 0] = jnp.sum(acc_ref[...])


def _charbonnier_bulk_sum(xb, yb, eps, block_rows, num_par, blocks_per_core):
    """Sum of Charbonnier terms over a (bulk_rows, 128) slab via Pallas."""
    kernel = functools.partial(
        _charbonnier_sum_kernel, eps2=float(eps) * float(eps)
    )
    partials = pl.pallas_call(
        kernel,
        out_shape=jax.ShapeDtypeStruct((num_par, 1), jnp.float32),
        grid_spec=pltpu.PrefetchScalarGridSpec(
            num_scalar_prefetch=0,
            grid=(num_par, blocks_per_core),
            in_specs=[
                pl.BlockSpec(
                    (block_rows, LANES),
                    lambda c, i: (c * blocks_per_core + i, 0),
                ),
                pl.BlockSpec(
                    (block_rows, LANES),
                    lambda c, i: (c * blocks_per_core + i, 0),
                ),
            ],
            # One scalar partial per parallel (core) index, resident across
            # the inner reduction axis.
            out_specs=pl.BlockSpec(
                (1, 1), lambda c, i: (c, 0), memory_space=pltpu.SMEM
            ),
            scratch_shapes=[pltpu.VMEM((SUBLANES, LANES), jnp.float32)],
        ),
        compiler_params=pltpu.CompilerParams(
            dimension_semantics=("parallel", "arbitrary"),
        ),
    )(xb, yb)
    return jnp.sum(partials)


def charbonnier_loss(x, y, eps=1e-3, block_rows=4096, loss_weight=1.0):
    """Charbonnier loss, mean reduction. x, y: same shape (e.g. NCHW)."""
    assert x.shape == y.shape, (x.shape, y.shape)
    n = int(x.size)

    xf = x.reshape(-1)
    yf = y.reshape(-1)

    # Sublane alignment: 8 rows for 32-bit dtypes, 16 for 16-bit (bf16/f16).
    align = SUBLANES * (2 if x.dtype.itemsize == 2 else 1)

    rows_total = n // LANES
    br = min(int(block_rows), rows_total)
    br = (br // align) * align  # multiple of the sublane tile, may be 0

    bulk = 0
    bulk_sum = jnp.float32(0.0)
    if br > 0:
        blocks_total = rows_total // br
        num_par = 2 if blocks_total >= 2 else 1  # megacore split (helps v7x)
        blocks_per_core = blocks_total // num_par
        bulk_rows = num_par * blocks_per_core * br
        bulk = bulk_rows * LANES
        # Prefix slice + contiguous reshape: no padded copy of the inputs.
        xb = jax.lax.slice(xf, (0,), (bulk,)).reshape(bulk_rows, LANES)
        yb = jax.lax.slice(yf, (0,), (bulk,)).reshape(bulk_rows, LANES)
        bulk_sum = _charbonnier_bulk_sum(
            xb, yb, eps, br, num_par, blocks_per_core
        )

    # Tail (fewer than num_par * block_rows * 128 elements) in plain JAX.
    if bulk < n:
        xt = xf[bulk:].astype(jnp.float32)
        yt = yf[bulk:].astype(jnp.float32)
        dt = xt - yt
        tail_sum = jnp.sum(
            jnp.sqrt(dt * dt + jnp.float32(float(eps) * float(eps)))
        )
    else:
        tail_sum = jnp.float32(0.0)

    return loss_weight * (bulk_sum + tail_sum) / jnp.float32(n)


if __name__ == "__main__":
    key = jax.random.PRNGKey(0)
    kx, ky = jax.random.split(key)

    # NCHW, small shapes: batch=2, channels=4, spatial=16x16.
    x = jax.random.normal(kx, (2, 4, 16, 16), dtype=jnp.float32)
    y = jax.random.normal(ky, (2, 4, 16, 16), dtype=jnp.float32)

    eps = 1e-3
    loss = charbonnier_loss(x, y, eps=eps)
    loss = jax.block_until_ready(loss)

    # Reference check in plain JAX.
    diff = x - y
    ref = jnp.mean(jnp.sqrt(diff * diff + eps * eps))
    assert jnp.allclose(loss, ref, rtol=1e-5, atol=1e-6), (loss, ref)

    print("KERNEL_OK")
</pallas_src>

<mosaic_0001>
module attributes {stable_mosaic.version = 11 : i64} {
  func.func @_charbonnier_sum_kernel(%arg0: i32, %arg1: i32, %arg2: memref<16x128xf32, #tpu.memory_space<vmem>>, %arg3: memref<16x128xf32, #tpu.memory_space<vmem>>, %arg4: memref<1x1xf32, #tpu.memory_space<smem>>, %arg5: memref<8x128xf32, #tpu.memory_space<vmem>>) attributes {dimension_semantics = [#tpu.dimension_semantics<parallel>, #tpu.dimension_semantics<arbitrary>], iteration_bounds = array<i64: 1, 1>, scalar_prefetch = 0 : i64, scratch_operands = 1 : i64, tpu.core_type = #tpu.core_type<tc>, window_params = [{transform_indices = @transform_0, window_bounds = array<i64: 16, 128>}, {transform_indices = @transform_1, window_bounds = array<i64: 16, 128>}, {transform_indices = @transform_2, window_bounds = array<i64: 1, 1>}]} {
    %c0_i32 = arith.constant 0 : i32
    %0 = arith.cmpi eq, %arg1, %c0_i32 : i32
    %1 = arith.extui %0 : i1 to i32
    %c0_i32_0 = arith.constant 0 : i32
    %2 = arith.cmpi ne, %1, %c0_i32_0 : i32
    scf.if %2 {
      %cst_11 = arith.constant 0.000000e+00 : f32
      %18 = vector.broadcast %cst_11 : f32 to vector<8x128xf32>
      %c0_12 = arith.constant 0 : index
      %c0_13 = arith.constant 0 : index
      %19 = vector.load %arg5[%c0_12, %c0_13] : memref<8x128xf32, #tpu.memory_space<vmem>>, vector<8x128xf32>
      tpu.vector_store %arg5[%c0_12, %c0_13], %18 {strides = array<i32>} : memref<8x128xf32, #tpu.memory_space<vmem>>, vector<8x128xf32>,
    } else {
    }
    %c0 = arith.constant 0 : index
    %c0_1 = arith.constant 0 : index
    %3 = vector.load %arg2[%c0, %c0_1] : memref<16x128xf32, #tpu.memory_space<vmem>>, vector<16x128xf32>
    %c0_2 = arith.constant 0 : index
    %c0_3 = arith.constant 0 : index
    %4 = vector.load %arg3[%c0_2, %c0_3] : memref<16x128xf32, #tpu.memory_space<vmem>>, vector<16x128xf32>
    %5 = arith.subf %3, %4 : vector<16x128xf32>
    %6 = arith.mulf %5, %5 : vector<16x128xf32>
    %cst = arith.constant 9.99999997E-7 : f32
    %7 = vector.broadcast %cst : f32 to vector<16x128xf32>
    %8 = arith.addf %6, %7 : vector<16x128xf32>
    %9 = math.sqrt %8 : vector<16x128xf32>
    %c0_4 = arith.constant 0 : index
    %c0_5 = arith.constant 0 : index
    %10 = vector.load %arg5[%c0_4, %c0_5] : memref<8x128xf32, #tpu.memory_space<vmem>>, vector<8x128xf32>
    %11 = vector.shape_cast %9 : vector<16x128xf32> to vector<2x8x128xf32>
    %cst_6 = arith.constant dense<0.000000e+00> : vector<8x128xf32>
    %12 = vector.multi_reduction <add>, %11, %cst_6 [0] : vector<2x8x128xf32> to vector<8x128xf32>
    %13 = arith.addf %10, %12 : vector<8x128xf32>
    %c0_7 = arith.constant 0 : index
    %c0_8 = arith.constant 0 : index
    %14 = vector.load %arg5[%c0_7, %c0_8] : memref<8x128xf32, #tpu.memory_space<vmem>>, vector<8x128xf32>
    tpu.vector_store %arg5[%c0_7, %c0_8], %13 {strides = array<i32>} : memref<8x128xf32, #tpu.memory_space<vmem>>, vector<8x128xf32>,
    %c0_i32_9 = arith.constant 0 : i32
    %15 = arith.cmpi eq, %arg1, %c0_i32_9 : i32
    %16 = arith.extui %15 : i1 to i32
    %c0_i32_10 = arith.constant 0 : i32
    %17 = arith.cmpi ne, %16, %c0_i32_10 : i32
    scf.if %17 {
      %c0_11 = arith.constant 0 : index
      %c0_12 = arith.constant 0 : index
      %18 = vector.load %arg5[%c0_11, %c0_12] : memref<8x128xf32, #tpu.memory_space<vmem>>, vector<8x128xf32>
      %19 = vector.shape_cast %18 : vector<8x128xf32> to vector<1x8x128xf32>
      %cst_13 = arith.constant dense<0.000000e+00> : vector<1xf32>
      %20 = vector.multi_reduction <add>, %19, %cst_13 [1, 2] : vector<1x8x128xf32> to vector<1xf32>
      %21 = vector.shape_cast %20 : vector<1xf32> to vector<1x1x1xf32>
      %22 = vector.extract %21[0, 0, 0] : f32 from vector<1x1x1xf32>
      %c0_14 = arith.constant 0 : index
      %c0_15 = arith.constant 0 : index
      %23 = memref.load %arg4[%c0_14, %c0_15] : memref<1x1xf32, #tpu.memory_space<smem>>
      memref.store %22, %arg4[%c0_14, %c0_15] : memref<1x1xf32, #tpu.memory_space<smem>>
    } else {
    }
    return
  }
  func.func @transform_0(%arg0: i32, %arg1: i32) -> (i32, i32) {
    %c1_i32 = arith.constant 1 : i32
    %0 = arith.muli %arg0, %c1_i32 : i32
    %1 = arith.addi %0, %arg1 : i32
    %c0_i32 = arith.constant 0 : i32
    %c0_i32_0 = arith.constant 0 : i32
    return %1, %c0_i32 : i32, i32
  }
  func.func @transform_1(%arg0: i32, %arg1: i32) -> (i32, i32) {
    %c1_i32 = arith.constant 1 : i32
    %0 = arith.muli %arg0, %c1_i32 : i32
    %1 = arith.addi %0, %arg1 : i32
    %c0_i32 = arith.constant 0 : i32
    %c0_i32_0 = arith.constant 0 : i32
    return %1, %c0_i32 : i32, i32
  }
  func.func @transform_2(%arg0: i32, %arg1: i32) -> (i32, i32) {
    %c0_i32 = arith.constant 0 : i32
    %c0_i32_0 = arith.constant 0 : i32
    return %arg0, %c0_i32 : i32, i32
  }
}

</mosaic_0001>

<bundles_post_ra>
// kernel: tpu_custom_call.1
= control target key start
LH: loop header
LB: loop body
LE: loop exit
PB: predicated region body
PF: predicated region fallthrough
CT: control target
= control target key end

     0   :  { %7 = vsyncpa [#allocation4], 0  ;;  %s242_s0 = inlined_call_operand.hbm [shape: f32[16,128], index: 0, kind: input, shape index: {}]   ;;  %s243_s1 = inlined_call_operand.hbm [shape: f32[16,128], index: 1, kind: input, shape index: {}]   ;;  %s244_s2 = inlined_call_operand.hbm [shape: f32[1,1], index: 2, kind: output, shape index: {}]  }
   0x1   :  { %8 = vsyncpa [#allocation7], 0 }
   0x2   :  { %9 = vsyncpa [#allocation5], 0  ;;  %s186_s9 = smov [#allocation3]   ;;  %s126_s13 = scalar_lea.hbm %s242_s0, 256 }
   0x3   :  { %s19_s10 = sshll.u32 %s186_s9, 4  ;;  %p127_p0 = scmp.ne.s32.totalorder %s242_s0, %s126_s13  ;;  %s20_s10 = int_to_ptr.vmem [resolvable:$true] %s19_s10 }
   0x4   :  { %p130_p1 = scmp.lt.u32.totalorder %s126_s13, %s242_s0 }
   0x6   :  { %p132_p2 = pnand %p130_p1, %p127_p0 }
   0x8   :  { %135 = shalt.err (!%p132_p2)
}
   0x9   :  { %s136_s18 = scalar_lea.vmem %s20_s10, 256  ;;  %p141_p4 = scmp.lt.s32.totalorder %s20_s10, %s20_s10 }
   0xa   :  { %p137_p3 = scmp.ne.s32.totalorder %s20_s10, %s136_s18  ;;  %p142_p5 = scmp.lt.s32.totalorder %s136_s18, %s136_s18 }
   0xc   :  { %p143_p6 = por %p142_p5, %p141_p4 }
   0xe   :  { %p144_p7 = pnand %p143_p6, %p137_p3 }
  0x10   :  { %147 = shalt.err (!%p144_p7)
}
  0x11   :  { %s187_s19 = smov 128   ;;  %s188_s20 = smov 8  }
  0x12   :  { %25 = dma.hbm_to_vmem [thread:$0]  %s242_s0, 256, %s20_s10, [#allocation4], %s187_s19, %s187_s19, %s188_s20  }
  0x13   :  { %s189_s23 = smov [#allocation6]   ;;  %s148_s27 = scalar_lea.hbm %s243_s1, 256 }
  0x14   :  { %s35_s24 = sshll.u32 %s189_s23, 4  ;;  %p149_p8 = scmp.ne.s32.totalorder %s243_s1, %s148_s27  ;;  %s36_s24 = int_to_ptr.vmem [resolvable:$true] %s35_s24 }
  0x15   :  { %p152_p9 = scmp.lt.u32.totalorder %s148_s27, %s243_s1 }
  0x17   :  { %p154_p10 = pnand %p152_p9, %p149_p8 }
  0x19   :  { %157 = shalt.err (!%p154_p10)
}
  0x1a   :  { %s158_s4 = scalar_lea.vmem %s36_s24, 256  ;;  %p163_p12 = scmp.lt.s32.totalorder %s36_s24, %s36_s24 }
  0x1b   :  { %p159_p11 = scmp.ne.s32.totalorder %s36_s24, %s158_s4  ;;  %p164_p13 = scmp.lt.s32.totalorder %s158_s4, %s158_s4 }
  0x1d   :  { %p165_p0 = por %p164_p13, %p163_p12 }
  0x1f   :  { %p166_p1 = pnand %p165_p0, %p159_p11 }
  0x21   :  { %169 = shalt.err (!%p166_p1)
}
  0x22   :  { %41 = dma.hbm_to_vmem [thread:$0]  %s243_s1, 256, %s36_s24, [#allocation7], %s187_s19, %s187_s19, %s188_s20  }
  0x23   :  { %180 = dma.done.wait [#allocation4], 256  }
  0x24   :  { %181 = vsyncadd [#allocation4], 4294967040 }
  0x25   :  { %182 = dma.done.wait [#allocation7], 256  }
  0x26   :  { %183 = vsyncadd [#allocation7], 4294967040  ;;  %v57_v0 = vld [vmem:[#allocation3] sm:$0xff]  ;;  %v58_v1 = vld [vmem:[#allocation3 + $0x8] sm:$0xff]  ;;  %s170_s8 = scalar_lea.hbm %s244_s2, 16 }
  0x27   :  { %v59_v2 = vld [vmem:[#allocation6] sm:$0xff]  ;;  %v60_v3 = vld [vmem:[#allocation6 + $0x8] sm:$0xff]  ;;  %p171_p2 = scmp.ne.s32.totalorder %s244_s2, %s170_s8  ;;  %p174_p3 = scmp.lt.u32.totalorder %s170_s8, %s244_s2 }
  0x28   :  { %v61_v4 = vsub.f32 %v57_v0, %v59_v2  ;;  %v62_v5 = vsub.f32 %v58_v1, %v60_v3 }
  0x29   :  { %p176_p4 = pnand %p174_p3, %p171_p2 }
  0x2a   :  { %v63_v6 = vmul.f32 %v61_v4, %v61_v4  ;;  %v64_v7 = vmul.f32 %v62_v5, %v62_v5 }
  0x2c   :  { %v65_v8 = vadd.f32 1e-06, %v63_v6  ;;  %v66_v9 = vadd.f32 1e-06, %v64_v7 }
  0x2e   :  { %122 = vrsqrt.f32 %v65_v8  ;;  %vm69_vm0 = vcmp.eq.f32.partialorder %v65_v8, inf  ;;  %v72_v11 = vand.u32 2147483648, %v65_v8  ;;  %vm71_vm1 = vcmp.eq.f32.partialorder %v65_v8, 0.0 }
  0x2f   :  { %124 = vrsqrt.f32 %v66_v9  ;;  %vm76_vm2 = vcmp.eq.f32.partialorder %v66_v9, inf  ;;  %v79_v14 = vand.u32 2147483648, %v66_v9  ;;  %vm78_vm3 = vcmp.eq.f32.partialorder %v66_v9, 0.0 }
  0x38   :  { %v123_v10 = vpop.eup %122 }
  0x39   :  { %v125_v12 = vpop.eup %124  ;;  %v68_v13 = vmul.f32 %v123_v10, %v65_v8 }
  0x3a   :  { %v75_v15 = vmul.f32 %v125_v12, %v66_v9 }
  0x3b   :  { %v70_v16 = vsel %vm69_vm0, %v65_v8, %v68_v13 }
  0x3c   :  { %v73_v17 = vsel %vm71_vm1, %v72_v11, %v70_v16  ;;  %v77_v18 = vsel %vm76_vm2, %v66_v9, %v75_v15 }
  0x3d   :  { %v80_v19 = vsel %vm78_vm3, %v79_v14, %v77_v18 }
  0x3e   :  { %v82_v20 = vadd.f32 %v80_v19, %v73_v17 }
  0x40   :  { %89 = vadd.xlane.f32.xlu0 %v82_v20 }
  0xcd   :  { %v90_v21 = vpop.xlane.xlu0 %89 }
  0xce   :  { %v91_v22 = vrot.slane %v90_v21, 4 }
  0xd0   :  { %v92_v23 = vadd.f32 %v91_v22, %v90_v21 }
  0xd2   :  { %v93_v24 = vrot.slane %v92_v23, 2 }
  0xd4   :  { %v94_v25 = vadd.f32 %v93_v24, %v92_v23 }
  0xd6   :  { %v95_v26 = vrot.slane %v94_v25, 1 }
  0xd8   :  { %v96_v27 = vadd.f32 %v95_v26, %v94_v25 }
  0xda   :  { %115 = vpush %v96_v27 }
 0x10b   :  { %s116_s1 = spop %115 }
 0x10c   :  { %99 = sst [smem:[#allocation8]] %s116_s1 }
 0x10d   :  { %179 = shalt.err (!%p176_p4)
}
 0x10e   :  { %s190_s13 = smov [#allocation8]  }
 0x10f   :  { %107 = dma.smem_to_hbm %s190_s13, 16, %s244_s2, [#allocation5]  }
 0x110   :  { %184 = dma.done.wait [#allocation5], 16  }
 0x111   :  { %185 = vsyncadd [#allocation5], 4294967280 }
 0x112   :  { %111 = sfence }
 0x113   :  { %112 = vsyncpa [#allocation4], 1 }
 0x114   :  { %113 = vsyncpa [#allocation7], 1 }
 0x115   :  { %114 = vsyncpa [#allocation5], 1 }

</bundles_post_ra>
